<compile_context>
chip_gen: v7x
topology: tpu7x:2x2x1
jax: 0.10.0
libtpu: 0.0.40
codegen_flags: <defaults>
</compile_context>

<pallas_src>
import math
from functools import partial

import jax
import jax.numpy as jnp
from jax.experimental import pallas as pl
from jax.experimental.pallas import tpu as pltpu

_VMEM_TILE_BUDGET = 20 * 1024 * 1024  # double-buffered x-tile budget (v7x-safe)
_MAX_S_TILE = 2048                    # amortizes per-step overhead on v5e/v6e


def _channel_attention_kernel(x_ref, w1_ref, w2_ref, o_ref, max_sc, sum_sc,
                              *, hw_total, s_tile, needs_mask):
    # x_ref : (B, C, S_TILE)  input dtype
    # w1_ref: (Cr, C)   w2_ref: (C, Cr)
    # o_ref : (B, C)    max_sc/sum_sc: (B, C) f32 scratch (resident accumulators)
    s = pl.program_id(0)
    n_s = pl.num_programs(0)

    @pl.when(s == 0)
    def _init():
        max_sc[...] = jnp.full_like(max_sc, -jnp.inf)
        sum_sc[...] = jnp.zeros_like(sum_sc)

    x = x_ref[...]  # keep in input dtype on the dominant data path

    if needs_mask:
        col = jax.lax.broadcasted_iota(jnp.int32, x.shape, dimension=2)
        valid = (s * s_tile + col) < hw_total
        x_max = jnp.where(valid, x, jnp.array(-jnp.inf, dtype=x.dtype))
        x_sum = jnp.where(valid, x, jnp.array(0, dtype=x.dtype))
    else:
        x_max = x
        x_sum = x

    # Per-tile partial reductions in input dtype; accumulate partials in f32.
    tile_max = jnp.max(x_max, axis=-1)  # (B, C)
    tile_sum = jnp.sum(x_sum, axis=-1)  # (B, C)
    max_sc[...] = jnp.maximum(max_sc[...], tile_max.astype(jnp.float32))
    sum_sc[...] = sum_sc[...] + tile_sum.astype(jnp.float32)

    @pl.when(s == n_s - 1)
    def _finalize():
        max_pool = max_sc[...]                               # (B, C) f32
        avg_pool = sum_sc[...] * jnp.float32(1.0 / hw_total)  # (B, C) f32

        # Fuse the two SE passes: one (2B, C) operand, two matmuls total.
        pooled = jnp.concatenate([max_pool, avg_pool], axis=0)  # (2B, C)
        w1 = w1_ref[...].astype(jnp.float32)  # (Cr, C)
        w2 = w2_ref[...].astype(jnp.float32)  # (C, Cr)

        # Contract on the weights' second axis directly (no in-kernel .T).
        dn = (((1,), (1,)), ((), ()))
        h = jax.lax.dot_general(pooled, w1, dn,
                                preferred_element_type=jnp.float32)  # (2B, Cr)
        h = jnp.maximum(h, 0.0)
        y = jax.lax.dot_general(h, w2, dn,
                                preferred_element_type=jnp.float32)  # (2B, C)

        half = y.shape[0] // 2
        out = jax.nn.sigmoid(y[:half] + y[half:])  # (B, C)
        o_ref[...] = out.astype(o_ref.dtype)


def _choose_s_tile(B, C, hw, itemsize):
    """Largest lane-aligned spatial tile whose double-buffered copy fits budget."""
    if hw <= 128:
        return hw
    max_lanes = _VMEM_TILE_BUDGET // max(1, 2 * B * C * itemsize)
    s_tile = min(hw, _MAX_S_TILE, max(128, (max_lanes // 128) * 128))
    if s_tile >= hw:
        return hw
    return max(128, (s_tile // 128) * 128)


def channel_attention(x, w1, w2, s_tile=None):
    """x: (B, C, H, W) NCHW; w1: (Cr, C); w2: (C, Cr). Returns (B, C, 1, 1)."""
    B, C, H, W = x.shape
    Cr = w1.shape[0]
    HW = H * W
    x3 = x.reshape(B, C, HW)

    itemsize = jnp.dtype(x.dtype).itemsize
    if s_tile is None:
        s_tile = _choose_s_tile(B, C, HW, itemsize)
    s_tile = min(s_tile, HW)
    needs_mask = (HW % s_tile) != 0
    num_s = pl.cdiv(HW, s_tile)

    # Explicit scoped-VMEM limit: double-buffered x tiles + small headroom,
    # kept well under v7x's 64 MiB physical VMEM.
    tile_bytes = B * C * s_tile * itemsize
    vmem_limit = int(min(48 * 1024 * 1024,
                         max(8 * 1024 * 1024, 4 * tile_bytes + (2 << 20))))

    kernel = partial(_channel_attention_kernel,
                     hw_total=HW, s_tile=s_tile, needs_mask=needs_mask)

    out = pl.pallas_call(
        kernel,
        out_shape=jax.ShapeDtypeStruct((B, C), x.dtype),
        grid_spec=pltpu.PrefetchScalarGridSpec(
            num_scalar_prefetch=0,
            grid=(num_s,),
            in_specs=[
                pl.BlockSpec((B, C, s_tile), lambda s: (0, 0, s)),
                pl.BlockSpec((Cr, C), lambda s: (0, 0)),
                pl.BlockSpec((C, Cr), lambda s: (0, 0)),
            ],
            # Output stays resident across the spatial reduction axis.
            out_specs=pl.BlockSpec((B, C), lambda s: (0, 0)),
            scratch_shapes=[
                pltpu.VMEM((B, C), jnp.float32),  # running max
                pltpu.VMEM((B, C), jnp.float32),  # running sum
            ],
        ),
        compiler_params=pltpu.CompilerParams(
            dimension_semantics=("arbitrary",),
            vmem_limit_bytes=vmem_limit,
        ),
    )(x3, w1, w2)
    return out.reshape(B, C, 1, 1)


if __name__ == "__main__":
    # Module config: channel=4, attn_red_ratio=0.5 -> reduced channels = ceil(4*0.5) = 2
    B, C, H, W = 2, 4, 16, 16
    attn_red_ratio = 0.5
    Cr = math.ceil(C * attn_red_ratio)

    key = jax.random.PRNGKey(0)
    kx, kw1, kw2 = jax.random.split(key, 3)

    x = jax.random.normal(kx, (B, C, H, W), dtype=jnp.float32)
    # Bias-free 1x1 conv weights (Conv2d shapes (Cr, C, 1, 1) / (C, Cr, 1, 1), squeezed).
    w1 = jax.random.normal(kw1, (Cr, C), dtype=jnp.float32) * (1.0 / math.sqrt(C))
    w2 = jax.random.normal(kw2, (C, Cr), dtype=jnp.float32) * (1.0 / math.sqrt(Cr))

    # Pure-JAX reference of the same math.
    mx = jnp.max(x.reshape(B, C, -1), axis=-1)
    av = jnp.mean(x.reshape(B, C, -1), axis=-1)

    def se_ref(v):
        return jnp.maximum(v @ w1.T, 0.0) @ w2.T

    ref = jax.nn.sigmoid(se_ref(mx) + se_ref(av)).reshape(B, C, 1, 1)

    # 1) Multi-tile spatial reduction path (grid of 2 over H*W=256).
    out_tiled = channel_attention(x, w1, w2, s_tile=128)
    jax.block_until_ready(out_tiled)
    assert out_tiled.shape == (B, C, 1, 1)
    assert jnp.allclose(out_tiled, ref, atol=1e-5, rtol=1e-5)

    # 2) Auto-tiled path (single block at this tiny size).
    out_auto = channel_attention(x, w1, w2)
    jax.block_until_ready(out_auto)
    assert jnp.allclose(out_auto, ref, atol=1e-5, rtol=1e-5)

    print("KERNEL_OK")
</pallas_src>

<mosaic_0001>
module attributes {stable_mosaic.version = 11 : i64} {
  func.func @_channel_attention_kernel(%arg0: i32, %arg1: memref<2x4x128xf32, #tpu.memory_space<vmem>>, %arg2: memref<2x4xf32, #tpu.memory_space<vmem>>, %arg3: memref<4x2xf32, #tpu.memory_space<vmem>>, %arg4: memref<2x4xf32, #tpu.memory_space<vmem>>, %arg5: memref<2x4xf32, #tpu.memory_space<vmem>>, %arg6: memref<2x4xf32, #tpu.memory_space<vmem>>) attributes {dimension_semantics = [#tpu.dimension_semantics<arbitrary>], iteration_bounds = array<i64: 2>, scalar_prefetch = 0 : i64, scratch_operands = 2 : i64, tpu.core_type = #tpu.core_type<tc>, window_params = [{transform_indices = @transform_0, window_bounds = array<i64: 2, 4, 128>}, {pipeline_mode = #tpu.pipeline_mode<synchronous>, transform_indices = @transform_1, window_bounds = array<i64: 2, 4>}, {pipeline_mode = #tpu.pipeline_mode<synchronous>, transform_indices = @transform_2, window_bounds = array<i64: 4, 2>}, {pipeline_mode = #tpu.pipeline_mode<synchronous>, transform_indices = @transform_3, window_bounds = array<i64: 2, 4>}]} {
    %c0_i32 = arith.constant 0 : i32
    %0 = arith.cmpi eq, %arg0, %c0_i32 : i32
    %1 = arith.extui %0 : i1 to i32
    %c0_i32_0 = arith.constant 0 : i32
    %2 = arith.cmpi ne, %1, %c0_i32_0 : i32
    scf.if %2 {
      %cst_13 = arith.constant 0xFF800000 : f32
      %15 = vector.broadcast %cst_13 : f32 to vector<2x4xf32>
      %c0_14 = arith.constant 0 : index
      %c0_15 = arith.constant 0 : index
      %16 = vector.load %arg5[%c0_14, %c0_15] : memref<2x4xf32, #tpu.memory_space<vmem>>, vector<2x4xf32>
      tpu.vector_store %arg5[%c0_14, %c0_15], %15 {strides = array<i32>} : memref<2x4xf32, #tpu.memory_space<vmem>>, vector<2x4xf32>,
      %cst_16 = arith.constant 0.000000e+00 : f32
      %17 = vector.broadcast %cst_16 : f32 to vector<2x4xf32>
      %c0_17 = arith.constant 0 : index
      %c0_18 = arith.constant 0 : index
      %18 = vector.load %arg6[%c0_17, %c0_18] : memref<2x4xf32, #tpu.memory_space<vmem>>, vector<2x4xf32>
      tpu.vector_store %arg6[%c0_17, %c0_18], %17 {strides = array<i32>} : memref<2x4xf32, #tpu.memory_space<vmem>>, vector<2x4xf32>,
    } else {
    }
    %c0 = arith.constant 0 : index
    %c0_1 = arith.constant 0 : index
    %c0_2 = arith.constant 0 : index
    %3 = vector.load %arg1[%c0, %c0_1, %c0_2] : memref<2x4x128xf32, #tpu.memory_space<vmem>>, vector<2x4x128xf32>
    %cst = arith.constant dense<0xFF800000> : vector<2x4xf32>
    %4 = vector.multi_reduction <maximumf>, %3, %cst [2] : vector<2x4x128xf32> to vector<2x4xf32>
    %cst_3 = arith.constant dense<0.000000e+00> : vector<2x4xf32>
    %5 = vector.multi_reduction <add>, %3, %cst_3 [2] : vector<2x4x128xf32> to vector<2x4xf32>
    %c0_4 = arith.constant 0 : index
    %c0_5 = arith.constant 0 : index
    %6 = vector.load %arg5[%c0_4, %c0_5] : memref<2x4xf32, #tpu.memory_space<vmem>>, vector<2x4xf32>
    %7 = arith.maximumf %6, %4 : vector<2x4xf32>
    %c0_6 = arith.constant 0 : index
    %c0_7 = arith.constant 0 : index
    %8 = vector.load %arg5[%c0_6, %c0_7] : memref<2x4xf32, #tpu.memory_space<vmem>>, vector<2x4xf32>
    tpu.vector_store %arg5[%c0_6, %c0_7], %7 {strides = array<i32>} : memref<2x4xf32, #tpu.memory_space<vmem>>, vector<2x4xf32>,
    %c0_8 = arith.constant 0 : index
    %c0_9 = arith.constant 0 : index
    %9 = vector.load %arg6[%c0_8, %c0_9] : memref<2x4xf32, #tpu.memory_space<vmem>>, vector<2x4xf32>
    %10 = arith.addf %9, %5 : vector<2x4xf32>
    %c0_10 = arith.constant 0 : index
    %c0_11 = arith.constant 0 : index
    %11 = vector.load %arg6[%c0_10, %c0_11] : memref<2x4xf32, #tpu.memory_space<vmem>>, vector<2x4xf32>
    tpu.vector_store %arg6[%c0_10, %c0_11], %10 {strides = array<i32>} : memref<2x4xf32, #tpu.memory_space<vmem>>, vector<2x4xf32>,
    %c1_i32 = arith.constant 1 : i32
    %12 = arith.cmpi eq, %arg0, %c1_i32 : i32
    %13 = arith.extui %12 : i1 to i32
    %c0_i32_12 = arith.constant 0 : i32
    %14 = arith.cmpi ne, %13, %c0_i32_12 : i32
    scf.if %14 {
      %c0_13 = arith.constant 0 : index
      %c0_14 = arith.constant 0 : index
      %15 = vector.load %arg5[%c0_13, %c0_14] : memref<2x4xf32, #tpu.memory_space<vmem>>, vector<2x4xf32>
      %c0_15 = arith.constant 0 : index
      %c0_16 = arith.constant 0 : index
      %16 = vector.load %arg6[%c0_15, %c0_16] : memref<2x4xf32, #tpu.memory_space<vmem>>, vector<2x4xf32>
      %cst_17 = arith.constant 3.906250e-03 : f32
      %17 = vector.broadcast %cst_17 : f32 to vector<2x4xf32>
      %18 = arith.mulf %16, %17 : vector<2x4xf32>
      %19 = tpu.concatenate %15, %18 in 0 : vector<2x4xf32>, vector<2x4xf32> -> vector<4x4xf32>
      %c0_18 = arith.constant 0 : index
      %c0_19 = arith.constant 0 : index
      %20 = vector.load %arg2[%c0_18, %c0_19] : memref<2x4xf32, #tpu.memory_space<vmem>>, vector<2x4xf32>
      %c0_20 = arith.constant 0 : index
      %c0_21 = arith.constant 0 : index
      %21 = vector.load %arg3[%c0_20, %c0_21] : memref<4x2xf32, #tpu.memory_space<vmem>>, vector<4x2xf32>
      %cst_22 = arith.constant dense<0.000000e+00> : vector<4x2xf32>
      %22 = tpu.matmul %19, %20, %cst_22 {dimension_numbers = #tpu.dot_dimension_numbers<[1], [1], [0], [0], [0, 0, 1, 0], [], []>} : vector<4x4xf32>, vector<2x4xf32>, vector<4x2xf32> -> vector<4x2xf32>
      %cst_23 = arith.constant 0.000000e+00 : f32
      %23 = vector.broadcast %cst_23 : f32 to vector<4x2xf32>
      %24 = arith.maximumf %22, %23 : vector<4x2xf32>
      %cst_24 = arith.constant dense<0.000000e+00> : vector<4x4xf32>
      %25 = tpu.matmul %24, %21, %cst_24 {dimension_numbers = #tpu.dot_dimension_numbers<[1], [1], [0], [0], [0, 0, 1, 0], [], []>} : vector<4x2xf32>, vector<4x2xf32>, vector<4x4xf32> -> vector<4x4xf32>
      %26 = vector.extract_strided_slice %25 {offsets = [0, 0], sizes = [2, 4], strides = [1, 1]} : vector<4x4xf32> to vector<2x4xf32>
      %27 = vector.extract_strided_slice %25 {offsets = [2, 0], sizes = [2, 4], strides = [1, 1]} : vector<4x4xf32> to vector<2x4xf32>
      %28 = arith.addf %26, %27 : vector<2x4xf32>
      %29 = arith.negf %28 : vector<2x4xf32>
      %30 = math.exp %29 : vector<2x4xf32>
      %cst_25 = arith.constant 1.000000e+00 : f32
      %31 = vector.broadcast %cst_25 : f32 to vector<2x4xf32>
      %32 = arith.addf %31, %30 : vector<2x4xf32>
      %33 = arith.divf %31, %32 : vector<2x4xf32>
      %c0_26 = arith.constant 0 : index
      %c0_27 = arith.constant 0 : index
      %34 = vector.load %arg4[%c0_26, %c0_27] : memref<2x4xf32, #tpu.memory_space<vmem>>, vector<2x4xf32>
      tpu.vector_store %arg4[%c0_26, %c0_27], %33 {strides = array<i32>} : memref<2x4xf32, #tpu.memory_space<vmem>>, vector<2x4xf32>,
    } else {
    }
    return
  }
  func.func @transform_0(%arg0: i32) -> (i32, i32, i32) {
    %c0_i32 = arith.constant 0 : i32
    %c0_i32_0 = arith.constant 0 : i32
    %c0_i32_1 = arith.constant 0 : i32
    return %c0_i32, %c0_i32_0, %arg0 : i32, i32, i32
  }
  func.func @transform_1(%arg0: i32) -> (i32, i32) {
    %c0_i32 = arith.constant 0 : i32
    %c0_i32_0 = arith.constant 0 : i32
    %c0_i32_1 = arith.constant 0 : i32
    return %c0_i32, %c0_i32_0 : i32, i32
  }
  func.func @transform_2(%arg0: i32) -> (i32, i32) {
    %c0_i32 = arith.constant 0 : i32
    %c0_i32_0 = arith.constant 0 : i32
    %c0_i32_1 = arith.constant 0 : i32
    return %c0_i32, %c0_i32_0 : i32, i32
  }
  func.func @transform_3(%arg0: i32) -> (i32, i32) {
    %c0_i32 = arith.constant 0 : i32
    %c0_i32_0 = arith.constant 0 : i32
    %c0_i32_1 = arith.constant 0 : i32
    return %c0_i32, %c0_i32_0 : i32, i32
  }
}

</mosaic_0001>

<bundles_post_ra>
// kernel: tpu_custom_call.1
= control target key start
LH: loop header
LB: loop body
LE: loop exit
PB: predicated region body
PF: predicated region fallthrough
CT: control target
= control target key end

     0   :  { %8 = vsyncpa [#allocation5], 0  ;;  %s818_s0 = inlined_call_operand.hbm [shape: f32[2,4,256], index: 0, kind: input, shape index: {}]   ;;  %s819_s1 = inlined_call_operand.vmem [shape: f32[2,4], index: 1, kind: input, shape index: {}]   ;;  %s820_s2 = inlined_call_operand.vmem [shape: f32[4,2], index: 2, kind: input, shape index: {}]   ;;  %s821_s3 = inlined_call_operand.hbm [shape: f32[2,4], index: 3, kind: output, shape index: {}]  }
   0x1   :  { %10 = vsyncpa [#allocation5 + $0x1], 0 }
   0x2   :  { %11 = vsyncpa [#allocation6], 0  ;;  %s683_s12 = smov 0   ;;  %s685_s13 = smov 0  }
   0x3   :  { %s687_s14 = smov 0   ;;  %s689_s15 = smov 0  }
   0x4 LB: > { %s702_s16 = sadd.s32 4294967295, %s652_s15   ;;  %s705_s17 = sadd.s32 1, %s652_s15   ;;  %s652_s15 = sphi %s689_s15, %s827_s15   ;;  %s648_s14 = sphi %s687_s14, %s826_s14   ;;  %s644_s13 = sphi %s685_s13, %s825_s13   ;;  %s640_s12 = sphi %s683_s12, %s824_s12  }
   0x5   : > { %s21_s18 = ssub.s32 %s652_s15, %s705_s17  ;;  %s24_s19 = sadd.s32 1, %s648_s14 }
   0x6   : > { %p22_p0 = scmp.eq.s32.totalorder %s21_s18, 0  ;;  %p31_p1 = scmp.ne.s32.totalorder %s648_s14, %s644_s13 }
   0x7   : > { %p32_p2 = scmp.eq.s32.totalorder %s652_s15, 0  ;;  %p37_p3 = scmp.ne.s32.totalorder %s644_s13, %s640_s12 }
   0x8   : > { %s715_s20 = scalar_select %p22_p0, %s648_s14, %s24_s19  }
   0x9   : > { %p33_p4 = por %p32_p2, %p31_p1  ;;  %p38_p5 = scmp.eq.s32.totalorder %s702_s16, 0 }
   0xa   : > { %p511_p6 = scmp.lt.s32.totalorder %s652_s15, 2  ;;  %s130_s22 = sand.u32 1, %s648_s14  }
   0xb   : > { %p719_p7 = por %p38_p5, %p37_p3  ;;  %s472_s23 = sshll.u32 %s130_s22, 3 }
   0xc   : > { %s473_s24 = sshll.u32 %s652_s15, 6  ;;  %s134_s28 = scalar_lea.vmem [#allocation4], %s472_s23 }
   0xd   : > { %s728_s27 = scalar_lea.hbm %s818_s0, %s473_s24  ;;  %s140_s29 = sshll.u32 %s134_s28, 4  ;;  %s730_s29 = int_to_ptr.vmem [resolvable:$true] %s140_s29 }
   0xe   : > { %p732_p8 = pnand %p511_p6, %p33_p4  ;;  %s736_s4 = scalar_lea.sflag [#allocation5], %s130_s22 }
   0xf   : > { %s558_s5 = scalar_lea.hbm %s728_s27, 128  ;;  %s563_s8 = scalar_lea.hbm %s818_s0, 256 }
  0x10   : > { %p559_p9 = scmp.ne.s32.totalorder %s728_s27, %s558_s5  ;;  %p560_p10 = pneg %p732_p8 }
  0x11   : > { %p564_p13 = scmp.lt.u32.totalorder %s728_s27, %s818_s0  ;;  %p565_p0 = scmp.lt.u32.totalorder %s563_s8, %s558_s5 }
  0x12   : > { %p561_p11 = pnand %p560_p10, %p559_p9  ;;  %p567_p2 = scmp.lt.u32.totalorder %s558_s5, %s728_s27 }
  0x13   : > { %p566_p1 = por %p565_p0, %p564_p13 }
  0x14   : > { %p562_p12 = pneg %p561_p11 }
  0x15   : > { %p568_p3 = por %p567_p2, %p566_p1 }
  0x17   : > { %p569_p4 = pnand %p568_p3, %p562_p12 }
  0x19   : > { %572 = shalt.err (!%p569_p4)
}
  0x1a   : > { %s573_s11 = scalar_lea.vmem %s730_s29, 128  ;;  %s654_s12 = smov [#allocation4]  }
  0x1b   : > { %p574_p5 = scmp.ne.s32.totalorder %s730_s29, %s573_s11  ;;  %s578_s18 = sshll.u32 %s654_s12, 4  ;;  %s579_s18 = int_to_ptr.vmem [resolvable:$false] %s578_s18 }
  0x1c   : > { %s580_s19 = scalar_lea.vmem %s579_s18, 256  ;;  %p581_p11 = scmp.lt.s32.totalorder %s730_s29, %s579_s18 }
  0x1d   : > { %p576_p6 = pnand %p574_p5, %p560_p10  ;;  %p582_p13 = scmp.lt.s32.totalorder %s580_s19, %s573_s11 }
  0x1f   : > { %p577_p9 = pneg %p576_p6  ;;  %p583_p0 = por %p582_p13, %p581_p11 }
  0x21   : > { %p584_p1 = pnand %p583_p0, %p577_p9 }
  0x23   : > { %587 = shalt.err (!%p584_p1)
}
  0x24   : > { %s655_s22 = smov 128   ;;  %s656_s23 = smov 64  }
  0x25   : > { %s657_s24 = smov 4   ;;  %p474_p10 = scmp.ge.s32.totalorder %s652_s15, 1 }
  0x26   : > { %510 = dma.hbm_to_vmem [thread:$0]  (!%p732_p8), %s728_s27, 128, %s730_s29, %s736_s4, %s655_s22, %s656_s23, %s657_s24  }
  0x27   : > { %p148_p12 = scmp.lt.s32.totalorder %s652_s15, 3 }
  0x29   : > { %p149_p2 = pnand %p474_p10, %p148_p12 }
  0x2a   : > { %s154_s25 = sand.u32 (!%p149_p2), 1, %s644_s13  }
  0x2b   : > { %152 = sbr.rel (%p149_p2) target bundleno = 708 (0x2c4), region = 32  ;;  %s475_s26 = sshll.u32 (!%p149_p2), %s154_s25, 3 }
  0x2c   : > { %s155_s28 = scalar_lea.sflag (!%p149_p2), [#allocation5], %s154_s25  ;;  %s158_s5 = scalar_lea.vmem (!%p149_p2), [#allocation4], %s475_s26 }
  0x32   : > { %631 = dma.done.wait (%p719_p7), %s155_s28, 128  }
  0x33   : > { %633 = vsyncadd (%p719_p7), %s155_s28, 4294967168  ;;  %p476_p3 = scmp.ne.s32.totalorder %s702_s16, 0 }
  0x34   : > { %vm180_vm0 = vcmask (!%p476_p3), 25600   ;;  %v658_v0 = vmov (!%p476_p3), -inf   ;;  %v659_v1 = vmov (!%p476_p3), 0.0  }
  0x35   : > { %179 = sbr.rel (%p476_p3) target bundleno = 60 (0x3c), region = 40  ;;  %181 = vst.msk [vmem:[#allocation2] sm:$0x3] (!%p476_p3), %vm180_vm0, %v658_v0  ;;  %182 = vst.msk [vmem:[#allocation3] sm:$0x3] (!%p476_p3), %vm180_vm0, %v659_v1 }
  0x3c PF: > { %v183_v2 = vld [vmem:[%s158_s5] sm:$0xf]  ;;  %vm185_vm1 = vcmask 1043456   ;;  %v184_v3 = vld [vmem:[%s158_s5 + $0x4] sm:$0xf]  ;;  %v201_v8 = vlaneseq  ;;  %vm211_vm2 = vcmask 1041409  }
  0x3d   : > { %v192_v4 = vsel %vm185_vm1, %v183_v2, 0.0  ;;  %v186_v5 = vsel %vm185_vm1, %v183_v2, -inf  ;;  %v195_v6 = vsel %vm185_vm1, %v184_v3, 0.0  ;;  %v189_v7 = vsel %vm185_vm1, %v184_v3, -inf  ;;  %v217_v18 = vld [vmem:[#allocation3] sm:$0x3] }
  0x3e   : > { %193 = vadd.xlane.f32.xlu1 %v192_v4  ;;  %187 = vmax.xlane.f32.xlu0 %v186_v5  ;;  %v202_v9 = vand.u32 127, %v201_v8  ;;  %v204_v10 = vshrl.u32 %v201_v8, 7  ;;  %v198_v20 = vld [vmem:[#allocation2] sm:$0x3]  ;;  %vm215_vm3 = vcmask 25600   ;;  %p477_p7 = scmp.ne.s32.totalorder %s702_s16, 1 }
  0x3f   : > { %v244_v26 = vld [vmem:[%s819_s1] sm:$0x3] (!%p477_p7)  ;;  %vm246_vm4 = vcmask (!%p477_p7), 31744   ;;  %v660_v27 = vmov (!%p477_p7), 0.0   ;;  %vm661_vm5 = vmmov (!%p477_p7), 0   ;;  %vm242_vm6 = vcmask (!%p477_p7), 1041408  }
  0x40   : > { %v205_v13 = vsub.s32 %v202_v9, %v204_v10  ;;  %491 = vmatprep.subr.mxu0 (!%p477_p7), %v660_v27  ;;  %493 = vmatprep.mubr.msk.f32.mxu0 (!%p477_p7), %vm661_vm5, %v660_v27  ;;  %v245_v33 = vld [vmem:[%s820_s2] sm:$0xf] (!%p477_p7)  ;;  %vm324_vm7 = vcmask (!%p477_p7), 15360  }
  0x41   : > { %492 = vmatpush3.xpose.msk.msra.mxu0 (!%p477_p7), %vm246_vm4, %v244_v26  ;;  %496 = vmatprep.subr.mxu1 (!%p477_p7), %v660_v27 }
  0x42   : > { %196 = vadd.xlane.f32.xlu1 %v195_v6  ;;  %190 = vmax.xlane.f32.xlu0 %v189_v7 }
  0x43   : > { %498 = vmatprep.mubr.msk.f32.mxu1 (!%p477_p7), %vm661_vm5, %v660_v27  ;;  %497 = vmatpush3.xpose.msk.msra.mxu1 (!%p477_p7), %vm324_vm7, %v245_v33 }
  0xcb   : > { %v194_v11 = vpop.xlane.xlu1 %193  ;;  %v188_v12 = vpop.xlane.xlu0 %187 }
  0xcc   : > { %v223_v16 = vrot.slane %v194_v11, %v205_v13  ;;  %v206_v17 = vrot.slane %v188_v12, %v205_v13 }
  0xcf   : > { %v197_v14 = vpop.xlane.xlu1 %196  ;;  %v191_v15 = vpop.xlane.xlu0 %190  ;;  %235 = sbr.rel (%p477_p7) target bundleno = 683 (0x2ab), region = 44 }
  0xd0   : > { %v227_v19 = vrot.slane %v197_v14, %v205_v13  ;;  %v210_v21 = vrot.slane %v191_v15, %v205_v13 }
  0xd2   : > { %v228_v22 = vsel %vm211_vm2, %v227_v19, %v223_v16  ;;  %v212_v23 = vsel %vm211_vm2, %v210_v21, %v206_v17 }
  0xd3   : > { %v230_v24 = vadd.f32 %v228_v22, %v217_v18  ;;  %v214_v25 = vmax.f32 %v198_v20, %v212_v23 }
  0xd5   : > { %231 = vst.msk [vmem:[#allocation3] sm:$0x3] %vm215_vm3, %v230_v24  ;;  %216 = vst.msk [vmem:[#allocation2] sm:$0x3] %vm215_vm3, %v214_v25 }
  0xdc   : > { %v237_v28 = vld [vmem:[#allocation3] sm:$0x3]  ;;  %v236_v30 = vld [vmem:[#allocation2] sm:$0x3] }
  0xdd   : > { %v238_v29 = vmul.f32 0.00390625, %v237_v28 }
  0xdf   : > { %v240_v31 = vrot.slane %v238_v29, 6 }
  0xe1   : > { %v243_v32 = vsel %vm242_vm6, %v236_v30, %v240_v31 }
  0xe2   : > { %494 = vmatmul.mubr.msk.f32.vlgmr.msra.gmra.mrb[0].mxu0 %vm246_vm4, %v243_v32 }
 0x1b5   : > { %v319_v34 = vpop.f32.mrb[0].mxu0 }
 0x1b6   : > { %v323_v35 = vmax.f32 %v319_v34, 0.0  ;;  %v495_v36 = vpop.f32.mrb[1].mxu0 }
 0x1b8   : > { %499 = vmatmul.mubr.msk.f32.vlgmr.msra.gmra.mrb[0].mxu1 %vm324_vm7, %v323_v35 }
 0x28b   : > { %v397_v37 = vpop.f32.mrb[0].mxu1 }
 0x28c   : > { %v402_v38 = vrot.slane %v397_v37, 2  ;;  %v500_v39 = vpop.f32.mrb[1].mxu1 }
 0x28e   : > { %v404_v40 = vadd.f32 %v402_v38, %v397_v37 }
 0x290   : > { %v482_v41 = vmul.f32 -1.442695, %v404_v40 }
 0x292   : > { %554 = vpow2.f32 %v482_v41 }
 0x29c   : > { %v555_v42 = vpop.eup %554 }
 0x29d   : > { %v408_v43 = vadd.f32 1.0, %v555_v42 }
 0x29f   : > { %556 = vrcp.f32 %v408_v43 }
 0x2a9   : > { %v557_v44 = vpop.eup %556 }
 0x2aa   : > { %411 = vst.msk [vmem:[#allocation7] sm:$0x3] %vm215_vm3, %v557_v44 }
 0x2ab PF: > { %p512_p8 = scmp.eq.s32.totalorder %s702_s16, 1  ;;  %s662_s30 = smov [#allocation7]  }
 0x2ac   : > { %s419_s4 = sshll.u32 %s662_s30, 4  ;;  %s420_s4 = int_to_ptr.vmem [resolvable:$true] %s419_s4 }
 0x2ad   : > { %s588_s6 = scalar_lea.vmem %s420_s4, 32  ;;  %p595_p9 = scmp.lt.s32.totalorder %s420_s4, %s420_s4 }
 0x2ae   : > { %p589_p4 = scmp.ne.s32.totalorder %s420_s4, %s588_s6  ;;  %p596_p11 = scmp.lt.s32.totalorder %s588_s6, %s588_s6 }
 0x2b0   : > { %p590_p5 = pnand %p589_p4, %p512_p8  ;;  %p597_p13 = por %p596_p11, %p595_p9 }
 0x2b2   : > { %p591_p6 = pneg %p590_p5 }
 0x2b4   : > { %p598_p0 = pnand %p597_p13, %p591_p6 }
 0x2b6   : > { %601 = shalt.err (!%p598_p0)
}
 0x2b7   : > { %s602_s9 = scalar_lea.hbm %s821_s3, 32 }
 0x2b8   : > { %p603_p1 = scmp.ne.s32.totalorder %s821_s3, %s602_s9  ;;  %p608_p2 = scmp.lt.u32.totalorder %s602_s9, %s821_s3 }
 0x2ba   : > { %p604_p10 = pnand %p603_p1, %p512_p8 }
 0x2bc   : > { %p605_p12 = pneg %p604_p10 }
 0x2be   : > { %p610_p3 = pnand %p608_p2, %p605_p12 }
 0x2c0   : > { %613 = shalt.err (!%p610_p3)
}
 0x2c1   : > { %504 = dma.vmem_to_hbm [thread:$0]  (%p512_p8), %s420_s4, 32, %s821_s3, [#allocation6]  }
 0x2c2   : > { %635 = dma.done.wait (%p512_p8), [#allocation6], 32  }
 0x2c3   : > { %637 = vsyncadd (%p512_p8), [#allocation6], 4294967264 }
 0x2c4 PF: > { %p14_p7 = scmp.ge.s32.totalorder %s705_s17, 4   ;;  %s824_s12 = smov %s644_s13 }
 0x2c5   : > { %s825_s13 = smov %s648_s14  ;;  %s826_s14 = smov %s715_s20 }
 0x2c6   : > { %s827_s15 = smov %s705_s17  ;;  %16 = sbr.rel (!%p14_p7) target bundleno = 4 (0x4), region = 77 }
 0x2cd   :  { %432 = vsyncpa [#allocation5], 1 }
 0x2ce   :  { %434 = vsyncpa [#allocation5 + $0x1], 1 }
 0x2cf   :  { %435 = vsyncpa [#allocation6], 1 }
 0x2d0   :  { %437 = vsyncpa [#allocation6 + $0x1], 1 }

</bundles_post_ra>
